<compile_context>
chip_gen: v7x
topology: tpu7x:2x2x1
jax: 0.10.0
libtpu: 0.0.40
codegen_flags: <defaults>
</compile_context>

<pallas_src>
import functools
import math

import jax
import jax.numpy as jnp
import numpy as np
from jax.experimental import pallas as pl
from jax.experimental.pallas import tpu as pltpu


def _round_up(x, m):
    return ((x + m - 1) // m) * m


def _pick_tb(batch, block_b):
    """Batch-tile size: large tiles, sublane-aligned, >=2 grid steps when possible."""
    tb = min(block_b, batch)
    if tb == batch:
        if batch >= 16:
            # Keep at least 2 grid steps so the "parallel" batch axis can shard
            # across the 2 TensorCores on v7x (negligible cost on v5e/v6e).
            tb = _round_up((batch + 1) // 2, 8)
        return tb                      # tiny batch: one full-extent block (always legal)
    return _round_up(tb, 8)


def _kernel_product_kernel(x_ref, wg_ref, s_ref, o_ref, *, kpe):
    """One (batch-tile, pair-tile) step of the kernel-product bilinear form.

    x_ref : (TB, FE_pad)       bf16 flattened fields for this batch tile
    wg_ref: (FE_pad, 2*KPE)    bf16 [W | G] slab for this pair tile
    s_ref : (KPE, KP)          f32 0/1 per-pair segment-sum matrix (shared)
    o_ref : (TB, KP)           f32 output block
    """
    xf = x_ref[...]
    # vi gather + i-contraction AND vj gather in a single lane-dense MXU matmul.
    tw = jnp.dot(xf, wg_ref[...], preferred_element_type=jnp.float32)
    t, vj = tw[:, :kpe], tw[:, kpe:]          # lane-aligned halves (KPE % 128 == 0)
    # Elementwise product (VPU) + per-pair segment sum (small MXU matmul).
    o_ref[...] = jnp.dot(t * vj, s_ref[...], preferred_element_type=jnp.float32)


def build_kernel_product_slabs(kernel, nfield):
    """One-time HOST (numpy) re-layout of the (E, K, E) parameter into MXU slabs."""
    kernel_np = np.asarray(jax.device_get(kernel), dtype=np.float32)
    E, K, E2 = kernel_np.shape
    assert E == E2 and K == nfield * (nfield - 1) // 2 and K >= 1
    ti, tj = np.triu_indices(nfield, k=1)     # same pair order as torch.triu_indices
    FE_pad = _round_up(nfield * E, 128)       # lane-dense x / contraction dim

    if K > 128:
        KP = 128                                               # full 128-lane out blocks
    else:
        KP = _round_up(K, max(1, 128 // math.gcd(E, 128)))     # ensures KP*E % 128 == 0
    k_tiles = -(-K // KP)
    KPE = KP * E

    # wg: per pair-tile horizontal slab [W_tile | G_tile]; tiles concatenated along
    # lanes so a single column-block index selects one pair tile.
    wg = np.zeros((FE_pad, k_tiles * 2 * KPE), np.float32)
    eye = np.eye(E, dtype=np.float32)
    for k in range(K):
        i, j = int(ti[k]), int(tj[k])
        t, p = divmod(k, KP)
        c0 = t * 2 * KPE
        wg[i * E:(i + 1) * E, c0 + p * E:c0 + (p + 1) * E] = kernel_np[:, k, :]       # W
        wg[j * E:(j + 1) * E, c0 + KPE + p * E:c0 + KPE + (p + 1) * E] = eye          # G

    # s: 0/1 segment-sum matrix; identical for every pair tile -> one resident copy.
    s = np.zeros((KPE, KP), np.float32)
    for p in range(KP):
        s[p * E:(p + 1) * E, p] = 1.0

    return dict(
        wg=jnp.asarray(wg, dtype=jnp.bfloat16),   # bf16 MXU operand (halves VMEM/HBM)
        s=jnp.asarray(s, dtype=jnp.float32),      # tiny, exact, VMEM-resident
        nfield=nfield, nemb=E, n_pairs=K,
        fe_pad=FE_pad, kp=KP, kpe=KPE, k_tiles=k_tiles)


def kernel_product(x, slabs, *, block_b=512):
    """x: (B, F, E) float, slabs: from build_kernel_product_slabs -> (B, K) float32."""
    B, F, E = x.shape
    assert F == slabs["nfield"] and E == slabs["nemb"]
    K = slabs["n_pairs"]
    FE, FE_pad = F * E, slabs["fe_pad"]
    KP, KPE, k_tiles = slabs["kp"], slabs["kpe"], slabs["k_tiles"]
    wg, s = slabs["wg"], slabs["s"]

    TB = _pick_tb(B, block_b)
    grid_b = -(-B // TB)
    B_pad = grid_b * TB

    # Contiguous reshape + bf16 cast (halves the dominant streamed HBM read).
    # Explicit zero-padding keeps every block sublane/lane aligned; padded rows /
    # columns contribute exact zeros.
    x_flat = x.reshape(B, FE).astype(jnp.bfloat16)
    if B_pad != B or FE_pad != FE:
        x_flat = jnp.pad(x_flat, ((0, B_pad - B), (0, FE_pad - FE)))

    # Constant-index slabs do not need a second pipeline buffer.
    if k_tiles == 1:
        wg_spec = pl.BlockSpec((FE_pad, 2 * KPE), lambda b, k: (0, k),
                               pipeline_mode=pl.Buffered(1))
    else:
        wg_spec = pl.BlockSpec((FE_pad, 2 * KPE), lambda b, k: (0, k))
    s_spec = pl.BlockSpec((KPE, KP), lambda b, k: (0, 0),
                          pipeline_mode=pl.Buffered(1))

    out_pad = pl.pallas_call(
        functools.partial(_kernel_product_kernel, kpe=KPE),
        out_shape=jax.ShapeDtypeStruct((B_pad, k_tiles * KP), jnp.float32),
        grid=(grid_b, k_tiles),
        in_specs=[
            # Streamed activations: double-buffered, constant across the pair axis.
            pl.BlockSpec((TB, FE_pad), lambda b, k: (b, 0)),
            wg_spec,
            s_spec,
        ],
        out_specs=pl.BlockSpec((TB, KP), lambda b, k: (b, k)),
        compiler_params=pltpu.CompilerParams(
            # Both axes independent -> shard across the 2 TCs on v7x.
            dimension_semantics=("parallel", "parallel"),
            # Explicit VMEM budget, valid on v5e/v6e (128 MiB) and v7x (64 MiB phys).
            vmem_limit_bytes=32 * 1024 * 1024,
        ),
    )(x_flat, wg, s)
    return out_pad[:B, :K]


def init_kernel_param(key, nfield, nemb):
    """Deterministic xavier_uniform-style init for kernel of shape (E, K, E)."""
    K = nfield * (nfield - 1) // 2
    # PyTorch fan computation for >2-D tensors: fan_in = size(1)*prod(shape[2:]),
    # fan_out = size(0)*prod(shape[2:]); shape[2:] = (E,)
    fan_in = K * nemb
    fan_out = nemb * nemb
    bound = (6.0 / (fan_in + fan_out)) ** 0.5
    return jax.random.uniform(key, (nemb, K, nemb), jnp.float32,
                              minval=-bound, maxval=bound)


if __name__ == "__main__":
    B, F, E = 512, 4, 32            # batch, nfield, nemb -> K = 6 pairs
    key = jax.random.PRNGKey(0)
    kx, kk = jax.random.split(key)

    x = jax.random.normal(kx, (B, F, E), dtype=jnp.float32)
    kernel = init_kernel_param(kk, F, E)

    slabs = build_kernel_product_slabs(kernel, F)      # one-time host-side build
    out = jax.block_until_ready(kernel_product(x, slabs))

    # Pure-JAX reference of the PyTorch einsum (exact f32 precision).
    vi_idx, vj_idx = jnp.triu_indices(F, k=1)
    vi, vj = x[:, vi_idx], x[:, vj_idx]
    ref = jnp.einsum('bki,ikj,bkj->bk', vi, kernel, vj,
                     precision=jax.lax.Precision.HIGHEST)

    assert out.shape == (B, F * (F - 1) // 2)
    # Tolerance sized for bf16 MXU operands vs the exact f32 reference.
    max_err = float(jnp.max(jnp.abs(out - ref)))
    assert jnp.allclose(out, ref, rtol=3e-2, atol=3e-2), max_err
    print("KERNEL_OK")
</pallas_src>

<mosaic_0001>
module attributes {stable_mosaic.version = 11 : i64} {
  func.func @_kernel_product_kernel(%arg0: i32, %arg1: i32, %arg2: memref<256x128xbf16, #tpu.memory_space<vmem>>, %arg3: memref<128x512xbf16, #tpu.memory_space<vmem>>, %arg4: memref<256x8xf32, #tpu.memory_space<vmem>>, %arg5: memref<256x8xf32, #tpu.memory_space<vmem>>) attributes {dimension_semantics = [#tpu.dimension_semantics<parallel>, #tpu.dimension_semantics<parallel>], iteration_bounds = array<i64: 2, 1>, scalar_prefetch = 0 : i64, scratch_operands = 0 : i64, tpu.core_type = #tpu.core_type<tc>, window_params = [{transform_indices = @transform_0, window_bounds = array<i64: 256, 128>}, {pipeline_mode = #tpu.pipeline_mode<synchronous>, transform_indices = @transform_1, window_bounds = array<i64: 128, 512>}, {pipeline_mode = #tpu.pipeline_mode<synchronous>, transform_indices = @transform_2, window_bounds = array<i64: 256, 8>}, {transform_indices = @transform_3, window_bounds = array<i64: 256, 8>}]} {
    %c0 = arith.constant 0 : index
    %c0_0 = arith.constant 0 : index
    %0 = vector.load %arg2[%c0, %c0_0] : memref<256x128xbf16, #tpu.memory_space<vmem>>, vector<256x128xbf16>
    %c0_1 = arith.constant 0 : index
    %c0_2 = arith.constant 0 : index
    %1 = vector.load %arg3[%c0_1, %c0_2] : memref<128x512xbf16, #tpu.memory_space<vmem>>, vector<128x512xbf16>
    %cst = arith.constant dense<0.000000e+00> : vector<256x512xf32>
    %2 = tpu.matmul %0, %1, %cst {dimension_numbers = #tpu.dot_dimension_numbers<[1], [0], [0], [1], [0, 0, 1, 1], [], []>} : vector<256x128xbf16>, vector<128x512xbf16>, vector<256x512xf32> -> vector<256x512xf32>
    %3 = vector.extract_strided_slice %2 {offsets = [0, 0], sizes = [256, 256], strides = [1, 1]} : vector<256x512xf32> to vector<256x256xf32>
    %4 = vector.extract_strided_slice %2 {offsets = [0, 256], sizes = [256, 256], strides = [1, 1]} : vector<256x512xf32> to vector<256x256xf32>
    %5 = arith.mulf %3, %4 : vector<256x256xf32>
    %c0_3 = arith.constant 0 : index
    %c0_4 = arith.constant 0 : index
    %6 = vector.load %arg4[%c0_3, %c0_4] : memref<256x8xf32, #tpu.memory_space<vmem>>, vector<256x8xf32>
    %cst_5 = arith.constant dense<0.000000e+00> : vector<256x8xf32>
    %7 = tpu.matmul %5, %6, %cst_5 {dimension_numbers = #tpu.dot_dimension_numbers<[1], [0], [0], [1], [0, 0, 1, 1], [], []>} : vector<256x256xf32>, vector<256x8xf32>, vector<256x8xf32> -> vector<256x8xf32>
    %c0_6 = arith.constant 0 : index
    %c0_7 = arith.constant 0 : index
    %8 = vector.load %arg5[%c0_6, %c0_7] : memref<256x8xf32, #tpu.memory_space<vmem>>, vector<256x8xf32>
    tpu.vector_store %arg5[%c0_6, %c0_7], %7 {strides = array<i32>} : memref<256x8xf32, #tpu.memory_space<vmem>>, vector<256x8xf32>,
    return
  }
  func.func @transform_0(%arg0: i32, %arg1: i32) -> (i32, i32) {
    %c0_i32 = arith.constant 0 : i32
    %c0_i32_0 = arith.constant 0 : i32
    return %arg0, %c0_i32 : i32, i32
  }
  func.func @transform_1(%arg0: i32, %arg1: i32) -> (i32, i32) {
    %c0_i32 = arith.constant 0 : i32
    %c0_i32_0 = arith.constant 0 : i32
    return %c0_i32, %arg1 : i32, i32
  }
  func.func @transform_2(%arg0: i32, %arg1: i32) -> (i32, i32) {
    %c0_i32 = arith.constant 0 : i32
    %c0_i32_0 = arith.constant 0 : i32
    %c0_i32_1 = arith.constant 0 : i32
    return %c0_i32, %c0_i32_0 : i32, i32
  }
  func.func @transform_3(%arg0: i32, %arg1: i32) -> (i32, i32) {
    %c0_i32 = arith.constant 0 : i32
    return %arg0, %arg1 : i32, i32
  }
}

</mosaic_0001>

<bundles_post_ra>
// kernel: tpu_custom_call.1
= control target key start
LH: loop header
LB: loop body
LE: loop exit
PB: predicated region body
PF: predicated region fallthrough
CT: control target
= control target key end

     0   :  { %8 = vsyncpa [#allocation3], 0  ;;  %s1677_s12 = smov 0   ;;  %s1679_s13 = smov 0   ;;  %s2220_s0 = inlined_call_operand.vmem [shape: bf16[512,128], index: 0, kind: input, shape index: {}]   ;;  %s2221_s1 = inlined_call_operand.hbm [shape: bf16[128,512], index: 1, kind: input, shape index: {}]   ;;  %s2222_s2 = inlined_call_operand.vmem [shape: f32[256,8], index: 2, kind: input, shape index: {}]   ;;  %s2223_s3 = inlined_call_operand.vmem [shape: f32[512,8], index: 3, kind: output, shape index: {}]  }
   0x1   :  { %s1681_s14 = smov 0  }
   0x2 LB: > { %s1368_s15 = sadd.s32 4294967295, %s1650_s14   ;;  %s26_s16 = sadd.s32 1, %s1646_s13  ;;  %s1650_s14 = sphi %s1681_s14, %s14_s14   ;;  %s1646_s13 = sphi %s1679_s13, %s2257_s13   ;;  %s1642_s12 = sphi %s1677_s12, %s2256_s12  }
   0x3   : > { %p28_p0 = scmp.ge.s32.totalorder %s26_s16, 2  ;;  %p1370_p1 = scmp.ge.s32.totalorder %s1650_s14, 1 }
   0x4   : > { %p132_p2 = scmp.lt.s32.totalorder %s1650_s14, 3  ;;  %p1702_p4 = scmp.eq.s32.totalorder %s1368_s15, 0 }
   0x5   : > { %s2259_s16 = smov (%p28_p0, %s26_s16), 0  ;;  %s1652_s19 = smov [#allocation2]  }
   0x6   : > { %p1698_p3 = pnand %p1370_p1, %p132_p2  ;;  %s147_s20 = sshll.u32 %s1652_s19, 4  ;;  %s148_s20 = int_to_ptr.vmem [resolvable:$true] %s147_s20 }
   0x7   : > { %s2228_s18 = scalar_select %p1702_p4, 1, 0 }
   0x8   : > { %s2227_s17 = scalar_select %p1698_p3, 1, 0 }
   0x9   : > { %p1497_p5 = pneg %p1698_p3  ;;  %s1596_s24 = scalar_lea.hbm %s2221_s1, 4096 }
   0xa   : > { %p1597_p7 = scmp.ne.s32.totalorder %s2221_s1, %s1596_s24  ;;  %p1603_p11 = scmp.lt.u32.totalorder %s1596_s24, %s2221_s1 }
   0xb   : > { %p1710_p6 = pnand %p1702_p4, %p1497_p5 }
   0xd   : > { %p1598_p8 = pneg %p1710_p6 }
   0xf   : > { %p1599_p9 = pnand %p1598_p8, %p1597_p7 }
  0x11   : > { %p1600_p10 = pneg %p1599_p9 }
  0x13   : > { %p1605_p12 = pnand %p1603_p11, %p1600_p10 }
  0x15   : > { %1608 = shalt.err (!%p1605_p12)
}
  0x16   : > { %s1609_s29 = scalar_lea.vmem %s148_s20, 4096  ;;  %p1617_p2 = scmp.lt.s32.totalorder %s148_s20, %s148_s20 }
  0x17   : > { %p1610_p13 = scmp.ne.s32.totalorder %s148_s20, %s1609_s29  ;;  %p1618_p5 = scmp.lt.s32.totalorder %s1609_s29, %s1609_s29 }
  0x19   : > { %p1612_p0 = pnand %p1610_p13, %p1598_p8  ;;  %p1619_p4 = por %p1618_p5, %p1617_p2 }
  0x1b   : > { %p1613_p1 = pneg %p1612_p0 }
  0x1d   : > { %p1620_p3 = pnand %p1619_p4, %p1613_p1 }
  0x1f   : > { %1623 = shalt.err (!%p1620_p3)
}
  0x20   : > { %s1653_s30 = smov 256   ;;  %s1654_s4 = smov 16  }
  0x21   : > { %1500 = dma.hbm_to_vmem [thread:$0]  (!%p1710_p6), %s2221_s1, 4096, %s148_s20, [#allocation3], %s1653_s30, %s1653_s30, %s1654_s4  }
  0x22   : > { %p2230_p7 = scmp.ne.s32.totalorder %s2227_s17, 0 }
  0x24   : > { %175 = sbr.rel (%p2230_p7) target bundleno = 697 (0x2b9), region = 32 }
  0x2b   : > { %p2231_p9 = scmp.ne.s32.totalorder %s2228_s18, 0 }
  0x2d   : > { %1637 = dma.done.wait (%p2231_p9), [#allocation3], 4096  }
  0x2e   : > { %1639 = vsyncadd (%p2231_p9), [#allocation3], 4294963200  ;;  %v1655_v0 = vmov 0   ;;  %s1375_s7 = sshll.u32 %s1642_s12, 5  ;;  %v1532_v1 = vld [vmem:[#allocation2 + $0x4] ss:$16 sps:$4 sm:$0xff]  }
  0x2f   : > { %651 = vmatprep.mubr.bf16.mxu1 %v1655_v0  ;;  %571 = vmatprep.mubr.bf16.mxu0 %v1655_v0  ;;  %p203_p3 = scmp.lt.s32.totalorder %s1375_s7, 63  ;;  %v1534_v2 = vld [vmem:[#allocation2] ss:$16 sps:$4 sm:$0xff]   ;;  %v1535_v3 = vld [vmem:[#allocation2 + $0x24] ss:$16 sps:$4 sm:$0xff]   ;;  %v990_v50 = vld [vmem:[%s2222_s2 + $0x8] sm:$0xff] }
  0x30   : > { %1477 = vmatprep.subr.bf16.mxu1 %v1532_v1  ;;  %539 = vmatprep.subr.bf16.mxu0 %v1532_v1  ;;  %v1537_v4 = vld [vmem:[#allocation2 + $0x20] ss:$16 sps:$4 sm:$0xff]   ;;  %v1538_v5 = vld [vmem:[#allocation2 + $0x44] ss:$16 sps:$4 sm:$0xff]   ;;  %v1559_v17 = vld [vmem:[#allocation2 + $0xc] ss:$16 sps:$4 sm:$0xff]  }
  0x31   : > { %s2261_s7 = smov (!%p203_p3, %s1375_s7), 63  ;;  %1485 = vmatpush1.bf16.msra.mxu1 %v1534_v2  ;;  %540 = vmatpush1.bf16.msra.mxu0 %v1534_v2  ;;  %v1540_v6 = vld [vmem:[#allocation2 + $0x40] ss:$16 sps:$4 sm:$0xff]   ;;  %v1541_v7 = vld [vmem:[#allocation2 + $0x64] ss:$16 sps:$4 sm:$0xff]   ;;  %v1656_v51 = vmov 0.0|0.0  }
  0x32   : > { %1478 = vmatprep.subr.bf16.mxu1 %v1535_v3  ;;  %541 = vmatprep.subr.bf16.mxu0 %v1535_v3  ;;  %s1376_s8 = sshll.u32 %s2261_s7, 2  ;;  %v1543_v8 = vld [vmem:[#allocation2 + $0x60] ss:$16 sps:$4 sm:$0xff]   ;;  %v1544_v9 = vld [vmem:[#allocation2 + $0x84] ss:$16 sps:$4 sm:$0xff]   ;;  %v992_v54 = vld [vmem:[%s2222_s2 + $0x18] sm:$0xff] }
  0x33   : > { %s1745_s11 = scalar_lea.vmem %s2220_s0, %s1376_s8  ;;  %v1546_v10 = vld [vmem:[#allocation2 + $0x80] ss:$16 sps:$4 sm:$0xff]   ;;  %v1547_v11 = vld [vmem:[#allocation2 + $0xa4] ss:$16 sps:$4 sm:$0xff]   ;;  %v1557_v20 = vld [vmem:[#allocation2 + $0x8] ss:$16 sps:$4 sm:$0xff]  }
  0x34   : > { %v1549_v12 = vld [vmem:[#allocation2 + $0xa0] ss:$16 sps:$4 sm:$0xff]   ;;  %v1550_v13 = vld [vmem:[#allocation2 + $0xc4] ss:$16 sps:$4 sm:$0xff]   ;;  %v1563_v21 = vld [vmem:[#allocation2 + $0x2c] ss:$16 sps:$4 sm:$0xff]  }
  0x35   : > { %1486 = vmatpush1.bf16.msra.mxu1 %v1537_v4  ;;  %542 = vmatpush1.bf16.msra.mxu0 %v1537_v4  ;;  %v1552_v14 = vld [vmem:[#allocation2 + $0xc0] ss:$16 sps:$4 sm:$0xff]   ;;  %v1553_v15 = vld [vmem:[#allocation2 + $0xe4] ss:$16 sps:$4 sm:$0xff]   ;;  %v1561_v22 = vld [vmem:[#allocation2 + $0x28] ss:$16 sps:$4 sm:$0xff]  }
  0x36   : > { %1479 = vmatprep.subr.bf16.mxu1 %v1538_v5  ;;  %543 = vmatprep.subr.bf16.mxu0 %v1538_v5  ;;  %v1555_v16 = vld [vmem:[#allocation2 + $0xe0] ss:$16 sps:$4 sm:$0xff]   ;;  %v1567_v23 = vld [vmem:[#allocation2 + $0x4c] ss:$16 sps:$4 sm:$0xff]   ;;  %v1565_v26 = vld [vmem:[#allocation2 + $0x48] ss:$16 sps:$4 sm:$0xff]  }
  0x37   : > { %v1748_v18 = vld [vmem:[%s1745_s11 + $0x40] sm:$0xff]   ;;  %v1758_v24 = vld [vmem:[%s1745_s11 + $0x48] sm:$0xff]   ;;  %v1768_v30 = vld [vmem:[%s1745_s11 + $0x50] sm:$0xff]   ;;  %s1378_s6 = sshll.u32 %s2261_s7, 3  ;;  %vm1246_vm0 = vcmask 64512  }
  0x38   : > { %v1751_v19 = vld [vmem:[%s1745_s11] sm:$0xff]   ;;  %v1761_v25 = vld [vmem:[%s1745_s11 + $0x8] sm:$0xff]   ;;  %v1590_v31 = vld [vmem:[%s1745_s11 + $0x10] sm:$0xff]   ;;  %s2145_s10 = scalar_lea.vmem %s2223_s3, %s1378_s6 }
  0x39   : > { %1487 = vmatpush1.bf16.msra.mxu1 %v1540_v6  ;;  %544 = vmatpush1.bf16.msra.mxu0 %v1540_v6  ;;  %v1571_v27 = vld [vmem:[#allocation2 + $0x6c] ss:$16 sps:$4 sm:$0xff]   ;;  %v1569_v28 = vld [vmem:[#allocation2 + $0x68] ss:$16 sps:$4 sm:$0xff]   ;;  %v1782_v41 = vld [vmem:[%s1745_s11 + $0x60] sm:$0xff]  }
  0x3a   : > { %1480 = vmatprep.subr.bf16.mxu1 %v1541_v7  ;;  %545 = vmatprep.subr.bf16.mxu0 %v1541_v7  ;;  %v1575_v29 = vld [vmem:[#allocation2 + $0x8c] ss:$16 sps:$4 sm:$0xff]   ;;  %v1573_v32 = vld [vmem:[#allocation2 + $0x88] ss:$16 sps:$4 sm:$0xff]   ;;  %v1592_v42 = vld [vmem:[%s1745_s11 + $0x20] sm:$0xff]  }
  0x3b   : > { %v1579_v33 = vld [vmem:[#allocation2 + $0xac] ss:$16 sps:$4 sm:$0xff]   ;;  %v1577_v34 = vld [vmem:[#allocation2 + $0xa8] ss:$16 sps:$4 sm:$0xff]   ;;  %v1796_v45 = vld [vmem:[%s1745_s11 + $0x70] sm:$0xff]  }
  0x3c   : > { %v1583_v35 = vld [vmem:[#allocation2 + $0xcc] ss:$16 sps:$4 sm:$0xff]   ;;  %v1581_v38 = vld [vmem:[#allocation2 + $0xc8] ss:$16 sps:$4 sm:$0xff]   ;;  %v1594_v46 = vld [vmem:[%s1745_s11 + $0x30] sm:$0xff]  }
  0x3d   : > { %1488 = vmatpush1.bf16.msra.mxu1 %v1543_v8  ;;  %546 = vmatpush1.bf16.msra.mxu0 %v1543_v8  ;;  %v1775_v36 = vld [vmem:[%s1745_s11 + $0x58] sm:$0xff]   ;;  %v1789_v43 = vld [vmem:[%s1745_s11 + $0x68] sm:$0xff]   ;;  %v989_v49 = vld [vmem:[%s2222_s2] sm:$0xff] }
  0x3e   : > { %1481 = vmatprep.subr.bf16.mxu1 %v1544_v9  ;;  %547 = vmatprep.subr.bf16.mxu0 %v1544_v9  ;;  %v1591_v37 = vld [vmem:[%s1745_s11 + $0x18] sm:$0xff]   ;;  %v1593_v44 = vld [vmem:[%s1745_s11 + $0x28] sm:$0xff]   ;;  %v1430_v52 = vpack.c.bf16 %v990_v50, %v989_v49  ;;  %v991_v53 = vld [vmem:[%s2222_s2 + $0x10] sm:$0xff] }
  0x3f   : > { %v1587_v39 = vld [vmem:[#allocation2 + $0xec] ss:$16 sps:$4 sm:$0xff]   ;;  %v1585_v40 = vld [vmem:[#allocation2 + $0xe8] ss:$16 sps:$4 sm:$0xff]   ;;  %v1433_v55 = vpack.c.bf16 %v992_v54, %v991_v53  ;;  %v993_v56 = vld [vmem:[%s2222_s2 + $0x20] sm:$0xff] }
  0x40   : > { %v1803_v47 = vld [vmem:[%s1745_s11 + $0x78] sm:$0xff]   ;;  %v994_v57 = vld [vmem:[%s2222_s2 + $0x28] sm:$0xff]  ;;  %v995_v59 = vld [vmem:[%s2222_s2 + $0x30] sm:$0xff] }
  0x41   : > { %1489 = vmatpush1.bf16.msra.mxu1 %v1546_v10  ;;  %548 = vmatpush1.bf16.msra.mxu0 %v1546_v10  ;;  %v1806_v48 = vld [vmem:[%s1745_s11 + $0x38] sm:$0xff]   ;;  %v1436_v58 = vpack.c.bf16 %v994_v57, %v993_v56  ;;  %v997_v62 = vld [vmem:[%s2222_s2 + $0x40] sm:$0xff]  ;;  %v998_v63 = vld [vmem:[%s2222_s2 + $0x48] sm:$0xff] }
  0x42   : > { %1482 = vmatprep.subr.bf16.mxu1 %v1547_v11  ;;  %549 = vmatprep.subr.bf16.mxu0 %v1547_v11  ;;  %v996_v60 = vld [vmem:[%s2222_s2 + $0x38] sm:$0xff]  ;;  %v1442_v1 = vpack.c.bf16 %v998_v63, %v997_v62  ;;  %v999_v2 = vld [vmem:[%s2222_s2 + $0x50] sm:$0xff]  ;;  %v1001_v5 = vld [vmem:[%s2222_s2 + $0x60] sm:$0xff] }
  0x43   : > { %v1439_v61 = vpack.c.bf16 %v996_v60, %v995_v59  ;;  %v1000_v3 = vld [vmem:[%s2222_s2 + $0x58] sm:$0xff]  ;;  %v1002_v6 = vld [vmem:[%s2222_s2 + $0x68] sm:$0xff]  ;;  %v1003_v8 = vld [vmem:[%s2222_s2 + $0x70] sm:$0xff] }
  0x44   : > { %v1445_v4 = vpack.c.bf16 %v1000_v3, %v999_v2  ;;  %v1448_v7 = vpack.c.bf16 %v1002_v6, %v1001_v5  ;;  %v1004_v9 = vld [vmem:[%s2222_s2 + $0x78] sm:$0xff]  ;;  %v1005_v11 = vld [vmem:[%s2222_s2 + $0x80] sm:$0xff] }
  0x45   : > { %1490 = vmatpush1.bf16.msra.mxu1 %v1549_v12  ;;  %550 = vmatpush1.bf16.msra.mxu0 %v1549_v12  ;;  %v1451_v10 = vpack.c.bf16 %v1004_v9, %v1003_v8  ;;  %v1006_v12 = vld [vmem:[%s2222_s2 + $0x88] sm:$0xff] }
  0x46   : > { %1483 = vmatprep.subr.bf16.mxu1 %v1550_v13  ;;  %551 = vmatprep.subr.bf16.mxu0 %v1550_v13  ;;  %v1454_v13 = vpack.c.bf16 %v1006_v12, %v1005_v11 }
  0x49   : > { %1491 = vmatpush1.bf16.msra.mxu1 %v1552_v14  ;;  %552 = vmatpush1.bf16.msra.mxu0 %v1552_v14  ;;  %v1007_v14 = vld [vmem:[%s2222_s2 + $0x90] sm:$0xff] }
  0x4a   : > { %1484 = vmatprep.subr.bf16.mxu1 %v1553_v15  ;;  %553 = vmatprep.subr.bf16.mxu0 %v1553_v15  ;;  %v1008_v15 = vld [vmem:[%s2222_s2 + $0x98] sm:$0xff] }
  0x4d   : > { %1492 = vmatpush1.bf16.msra.mxu1 %v1555_v16  ;;  %554 = vmatpush1.bf16.msra.mxu0 %v1555_v16  ;;  %v1457_v16 = vpack.c.bf16 %v1008_v15, %v1007_v14 }
  0x4e   : > { %732 = vmatprep.subr.bf16.mxu1 %v1559_v17  ;;  %1429 = vmatprep.subr.bf16.mxu0 %v1656_v51  ;;  %v1009_v17 = vld [vmem:[%s2222_s2 + $0xa0] sm:$0xff] }
  0x50   : > { %652 = vmatmul.mubr.bf16.vlgmr.msra.gmra.mrb[0].mxu1 %v1748_v18  ;;  %572 = vmatmul.mubr.bf16.vlgmr.msra.gmra.mrb[0].mxu0 %v1751_v19 }
  0x51   : > { %733 = vmatpush1.bf16.msra.mxu1 %v1557_v20  ;;  %661 = vmatprep.mubr.bf16.mxu1 %v1655_v0 }
  0x52   : > { %734 = vmatprep.subr.bf16.mxu1 %v1563_v21  ;;  %581 = vmatprep.mubr.bf16.mxu0 %v1655_v0  ;;  %v1011_v21 = vld [vmem:[%s2222_s2 + $0xb0] sm:$0xff] }
  0x53   : > { %1431 = vmatpush1.bf16.msra.mxu0 %v1430_v52 }
  0x54   : > { %1432 = vmatprep.subr.bf16.mxu0 %v1656_v51 }
  0x55   : > { %735 = vmatpush1.bf16.msra.mxu1 %v1561_v22  ;;  %v1012_v22 = vld [vmem:[%s2222_s2 + $0xb8] sm:$0xff] }
  0x56   : > { %736 = vmatprep.subr.bf16.mxu1 %v1567_v23  ;;  %v1463_v23 = vpack.c.bf16 %v1012_v22, %v1011_v21 }
  0x57   : > { %1434 = vmatpush1.bf16.msra.mxu0 %v1433_v55 }
  0x58   : > { %662 = vmatmul.mubr.bf16.gmra.mrb[4].mxu1 %v1758_v24  ;;  %582 = vmatmul.mubr.bf16.gmra.mrb[4].mxu0 %v1761_v25 }
  0x59   : > { %671 = vmatprep.mubr.bf16.mxu1 %v1655_v0  ;;  %737 = vmatpush1.bf16.msra.mxu1 %v1565_v26 }
  0x5a   : > { %738 = vmatprep.subr.bf16.mxu1 %v1571_v27  ;;  %591 = vmatprep.mubr.bf16.mxu0 %v1655_v0  ;;  %v1015_v27 = vld [vmem:[%s2222_s2 + $0xd0] sm:$0xff] }
  0x5b   : > { %1435 = vmatprep.subr.bf16.mxu0 %v1656_v51 }
  0x5c   : > { %1437 = vmatpush1.bf16.msra.mxu0 %v1436_v58 }
  0x5d   : > { %739 = vmatpush1.bf16.msra.mxu1 %v1569_v28  ;;  %1438 = vmatprep.subr.bf16.mxu0 %v1656_v51  ;;  %v1016_v28 = vld [vmem:[%s2222_s2 + $0xd8] sm:$0xff] }
  0x5e   : > { %740 = vmatprep.subr.bf16.mxu1 %v1575_v29  ;;  %v1469_v29 = vpack.c.bf16 %v1016_v28, %v1015_v27 }
  0x60   : > { %672 = vmatmul.mubr.bf16.gmra.mrb[8].mxu1 %v1768_v30  ;;  %592 = vmatmul.mubr.bf16.gmra.mrb[8].mxu0 %v1590_v31 }
  0x61   : > { %681 = vmatprep.mubr.bf16.mxu1 %v1655_v0  ;;  %741 = vmatpush1.bf16.msra.mxu1 %v1573_v32 }
  0x62   : > { %742 = vmatprep.subr.bf16.mxu1 %v1579_v33  ;;  %601 = vmatprep.mubr.bf16.mxu0 %v1655_v0  ;;  %v1019_v33 = vld [vmem:[%s2222_s2 + $0xf0] sm:$0xff] }
  0x63   : > { %1440 = vmatpush1.bf16.msra.mxu0 %v1439_v61 }
  0x64   : > { %1441 = vmatprep.subr.bf16.mxu0 %v1656_v51 }
  0x65   : > { %743 = vmatpush1.bf16.msra.mxu1 %v1577_v34  ;;  %v1020_v34 = vld [vmem:[%s2222_s2 + $0xf8] sm:$0xff] }
  0x66   : > { %744 = vmatprep.subr.bf16.mxu1 %v1583_v35  ;;  %v1475_v35 = vpack.c.bf16 %v1020_v34, %v1019_v33 }
  0x67   : > { %1443 = vmatpush1.bf16.msra.mxu0 %v1442_v1 }
  0x68   : > { %682 = vmatmul.mubr.bf16.gmra.mrb[12].mxu1 %v1775_v36  ;;  %602 = vmatmul.mubr.bf16.gmra.mrb[12].mxu0 %v1591_v37 }
  0x69   : > { %691 = vmatprep.mubr.bf16.mxu1 %v1655_v0  ;;  %745 = vmatpush1.bf16.msra.mxu1 %v1581_v38 }
  0x6a   : > { %746 = vmatprep.subr.bf16.mxu1 %v1587_v39  ;;  %611 = vmatprep.mubr.bf16.mxu0 %v1655_v0 }
  0x6b   : > { %1444 = vmatprep.subr.bf16.mxu0 %v1656_v51 }
  0x6c   : > { %1446 = vmatpush1.bf16.msra.mxu0 %v1445_v4 }
  0x6d   : > { %747 = vmatpush1.bf16.msra.mxu1 %v1585_v40  ;;  %1447 = vmatprep.subr.bf16.mxu0 %v1656_v51 }
  0x70   : > { %692 = vmatmul.mubr.bf16.gmra.mrb[16].mxu1 %v1782_v41  ;;  %612 = vmatmul.mubr.bf16.gmra.mrb[16].mxu0 %v1592_v42 }
  0x71   : > { %701 = vmatprep.mubr.bf16.mxu1 %v1655_v0  ;;  %621 = vmatprep.mubr.bf16.mxu0 %v1655_v0 }
  0x72   : > { %1449 = vmatpush1.bf16.msra.mxu0 %v1448_v7 }
  0x73   : > { %1450 = vmatprep.subr.bf16.mxu0 %v1656_v51 }
  0x76   : > { %1452 = vmatpush1.bf16.msra.mxu0 %v1451_v10 }
  0x77   : > { %1453 = vmatprep.subr.bf16.mxu0 %v1656_v51 }
  0x78   : > { %702 = vmatmul.mubr.bf16.gmra.mrb[20].mxu1 %v1789_v43  ;;  %622 = vmatmul.mubr.bf16.gmra.mrb[20].mxu0 %v1593_v44 }
  0x79   : > { %711 = vmatprep.mubr.bf16.mxu1 %v1655_v0  ;;  %631 = vmatprep.mubr.bf16.mxu0 %v1655_v0 }
  0x7a   : > { %1455 = vmatpush1.bf16.msra.mxu0 %v1454_v13 }
  0x7b   : > { %1456 = vmatprep.subr.bf16.mxu0 %v1656_v51 }
  0x7e   : > { %1458 = vmatpush1.bf16.msra.mxu0 %v1457_v16 }
  0x7f   : > { %1459 = vmatprep.subr.bf16.mxu0 %v1656_v51 }
  0x80   : > { %712 = vmatmul.mubr.bf16.gmra.mrb[24].mxu1 %v1796_v45  ;;  %632 = vmatmul.mubr.bf16.gmra.mrb[24].mxu0 %v1594_v46 }
  0x81   : > { %721 = vmatprep.mubr.bf16.mxu1 %v1655_v0  ;;  %641 = vmatprep.mubr.bf16.mxu0 %v1655_v0 }
  0x88   : > { %722 = vmatmul.mubr.bf16.gmra.mrb[28].mxu1 %v1803_v47  ;;  %642 = vmatmul.mubr.bf16.gmra.mrb[28].mxu0 %v1806_v48 }
  0x89   : > { %764 = vmatprep.mubr.bf16.mxu1 %v1655_v0 }
  0x90   : > { %765 = vmatmul.mubr.bf16.vlgmr.msra.gmra.mrb[32].mxu1 %v1751_v19  ;;  %v1010_v19 = vld [vmem:[%s2222_s2 + $0xa8] sm:$0xff] }
  0x91   : > { %774 = vmatprep.mubr.bf16.mxu1 %v1655_v0  ;;  %v1460_v20 = vpack.c.bf16 %v1010_v19, %v1009_v17 }
  0x93   : > { %1461 = vmatpush1.bf16.msra.mxu0 %v1460_v20 }
  0x94   : > { %1462 = vmatprep.subr.bf16.mxu0 %v1656_v51 }
  0x97   : > { %1464 = vmatpush1.bf16.msra.mxu0 %v1463_v23 }
  0x98   : > { %775 = vmatmul.mubr.bf16.gmra.mrb[36].mxu1 %v1761_v25  ;;  %1465 = vmatprep.subr.bf16.mxu0 %v1656_v51  ;;  %v1014_v25 = vld [vmem:[%s2222_s2 + $0xc8] sm:$0xff] }
  0x99   : > { %784 = vmatprep.mubr.bf16.mxu1 %v1655_v0 }
  0xa0   : > { %785 = vmatmul.mubr.bf16.gmra.mrb[40].mxu1 %v1590_v31  ;;  %v1018_v31 = vld [vmem:[%s2222_s2 + $0xe8] sm:$0xff] }
  0xa1   : > { %794 = vmatprep.mubr.bf16.mxu1 %v1655_v0 }
  0xa8   : > { %795 = vmatmul.mubr.bf16.gmra.mrb[44].mxu1 %v1591_v37 }
  0xa9   : > { %804 = vmatprep.mubr.bf16.mxu1 %v1655_v0 }
  0xb0   : > { %805 = vmatmul.mubr.bf16.gmra.mrb[48].mxu1 %v1592_v42 }
  0xb1   : > { %814 = vmatprep.mubr.bf16.mxu1 %v1655_v0 }
  0xb8   : > { %815 = vmatmul.mubr.bf16.gmra.mrb[52].mxu1 %v1593_v44 }
  0xb9   : > { %824 = vmatprep.mubr.bf16.mxu1 %v1655_v0 }
  0xc0   : > { %825 = vmatmul.mubr.bf16.gmra.mrb[56].mxu1 %v1594_v46 }
  0xc1   : > { %834 = vmatprep.mubr.bf16.mxu1 %v1655_v0 }
  0xc8   : > { %835 = vmatmul.mubr.bf16.gmra.mrb[60].mxu1 %v1806_v48 }
  0xc9   : > { %844 = vmatprep.mubr.bf16.mxu1 %v1655_v0 }
  0xd0   : > { %845 = vmatmul.mubr.bf16.gmra.mrb[64].mxu1 %v1748_v18  ;;  %v1013_v18 = vld [vmem:[%s2222_s2 + $0xc0] sm:$0xff] }
  0xd1   : > { %854 = vmatprep.mubr.bf16.mxu1 %v1655_v0  ;;  %v1466_v26 = vpack.c.bf16 %v1014_v25, %v1013_v18 }
  0xd3   : > { %1467 = vmatpush1.bf16.msra.mxu0 %v1466_v26 }
  0xd4   : > { %1468 = vmatprep.subr.bf16.mxu0 %v1656_v51 }
  0xd7   : > { %1470 = vmatpush1.bf16.msra.mxu0 %v1469_v29 }
  0xd8   : > { %855 = vmatmul.mubr.bf16.gmra.mrb[68].mxu1 %v1758_v24  ;;  %1471 = vmatprep.subr.bf16.mxu0 %v1656_v51  ;;  %v1017_v24 = vld [vmem:[%s2222_s2 + $0xe0] sm:$0xff] }
  0xd9   : > { %864 = vmatprep.mubr.bf16.mxu1 %v1655_v0  ;;  %v1472_v32 = vpack.c.bf16 %v1018_v31, %v1017_v24 }
  0xdb   : > { %1473 = vmatpush1.bf16.msra.mxu0 %v1472_v32 }
  0xdc   : > { %1474 = vmatprep.subr.bf16.mxu0 %v1656_v51 }
  0xdf   : > { %1476 = vmatpush1.bf16.msra.mxu0 %v1475_v35 }
  0xe0   : > { %865 = vmatmul.mubr.bf16.gmra.mrb[72].mxu1 %v1768_v30 }
  0xe1   : > { %874 = vmatprep.mubr.bf16.mxu1 %v1655_v0 }
  0xe8   : > { %875 = vmatmul.mubr.bf16.gmra.mrb[76].mxu1 %v1775_v36 }
  0xe9   : > { %884 = vmatprep.mubr.bf16.mxu1 %v1655_v0 }
  0xf0   : > { %885 = vmatmul.mubr.bf16.gmra.mrb[80].mxu1 %v1782_v41 }
  0xf1   : > { %894 = vmatprep.mubr.bf16.mxu1 %v1655_v0 }
  0xf8   : > { %895 = vmatmul.mubr.bf16.gmra.mrb[84].mxu1 %v1789_v43 }
  0xf9   : > { %904 = vmatprep.mubr.bf16.mxu1 %v1655_v0 }
 0x100   : > { %905 = vmatmul.mubr.bf16.gmra.mrb[88].mxu1 %v1796_v45 }
 0x101   : > { %914 = vmatprep.mubr.bf16.mxu1 %v1655_v0 }
 0x108   : > { %915 = vmatmul.mubr.bf16.gmra.mrb[92].mxu1 %v1803_v47 }
 0x123   : > { %v1949_v30 = vpop.f32.mrb[0].mxu1  ;;  %v1951_v37 = vpop.f32.mrb[0].mxu0 }
 0x124   : > { %v1953_v36 = vpop.f32.mrb[1].mxu1  ;;  %v1955_v38 = vpop.f32.mrb[1].mxu0 }
 0x125   : > { %v1957_v39 = vpop.f32.mrb[2].mxu1  ;;  %v1959_v40 = vpop.f32.mrb[2].mxu0 }
 0x126   : > { %v1961_v41 = vpop.f32.mrb[3].mxu1  ;;  %v1963_v42 = vpop.f32.mrb[3].mxu0 }
 0x12b   : > { %v1965_v43 = vpop.f32.mrb[4].mxu1  ;;  %v1967_v0 = vpop.f32.mrb[4].mxu0 }
 0x12c   : > { %v1969_v44 = vpop.f32.mrb[5].mxu1  ;;  %v1971_v45 = vpop.f32.mrb[5].mxu0 }
 0x12d   : > { %v1973_v46 = vpop.f32.mrb[6].mxu1  ;;  %v1975_v47 = vpop.f32.mrb[6].mxu0 }
 0x12e   : > { %v1977_v48 = vpop.f32.mrb[7].mxu1  ;;  %v1979_v49 = vpop.f32.mrb[7].mxu0 }
 0x133   : > { %v1981_v50 = vpop.f32.mrb[8].mxu1  ;;  %v1983_v51 = vpop.f32.mrb[8].mxu0 }
 0x134   : > { %v1985_v52 = vpop.f32.mrb[9].mxu1  ;;  %v1987_v53 = vpop.f32.mrb[9].mxu0 }
 0x135   : > { %v1989_v54 = vpop.f32.mrb[10].mxu1  ;;  %v1991_v55 = vpop.f32.mrb[10].mxu0 }
 0x136   : > { %v1993_v56 = vpop.f32.mrb[11].mxu1  ;;  %v1995_v57 = vpop.f32.mrb[11].mxu0 }
 0x13b   : > { %v1997_v58 = vpop.f32.mrb[12].mxu1  ;;  %v1999_v59 = vpop.f32.mrb[12].mxu0 }
 0x13c   : > { %v2001_v60 = vpop.f32.mrb[13].mxu1  ;;  %v2003_v61 = vpop.f32.mrb[13].mxu0 }
 0x13d   : > { %v2005_v62 = vpop.f32.mrb[14].mxu1  ;;  %v2007_v63 = vpop.f32.mrb[14].mxu0 }
 0x13e   : > { %v2009_v1 = vpop.f32.mrb[15].mxu1  ;;  %v2011_v2 = vpop.f32.mrb[15].mxu0 }
 0x143   : > { %v2013_v3 = vpop.f32.mrb[16].mxu1  ;;  %v2015_v4 = vpop.f32.mrb[16].mxu0 }
 0x144   : > { %v2017_v5 = vpop.f32.mrb[17].mxu1  ;;  %v2019_v6 = vpop.f32.mrb[17].mxu0 }
 0x145   : > { %v2021_v7 = vpop.f32.mrb[18].mxu1  ;;  %v2023_v8 = vpop.f32.mrb[18].mxu0 }
 0x146   : > { %v2025_v9 = vpop.f32.mrb[19].mxu1  ;;  %v2027_v10 = vpop.f32.mrb[19].mxu0 }
 0x14b   : > { %v2029_v11 = vpop.f32.mrb[20].mxu1  ;;  %v2031_v12 = vpop.f32.mrb[20].mxu0 }
 0x14c   : > { %2232 = vst [vmem:[#allocation5_spill] sm:$0xff] %v2029_v11  ;;  %v2033_v13 = vpop.f32.mrb[21].mxu1  ;;  %v2035_v14 = vpop.f32.mrb[21].mxu0 }
 0x14d   : > { %2233 = vst [vmem:[#allocation6_spill] sm:$0xff] %v2033_v13  ;;  %v2037_v15 = vpop.f32.mrb[22].mxu1  ;;  %v2039_v16 = vpop.f32.mrb[22].mxu0 }
 0x14e   : > { %2234 = vst [vmem:[#allocation7_spill] sm:$0xff] %v2037_v15  ;;  %v2041_v17 = vpop.f32.mrb[23].mxu1  ;;  %v2043_v19 = vpop.f32.mrb[23].mxu0 }
 0x14f   : > { %2235 = vst [vmem:[#allocation8_spill] sm:$0xff] %v2041_v17 }
 0x153   : > { %v2045_v20 = vpop.f32.mrb[24].mxu1  ;;  %v2047_v21 = vpop.f32.mrb[24].mxu0 }
 0x154   : > { %2236 = vst [vmem:[#allocation9_spill] sm:$0xff] %v2045_v20  ;;  %v2049_v22 = vpop.f32.mrb[25].mxu1  ;;  %v2051_v23 = vpop.f32.mrb[25].mxu0 }
 0x155   : > { %2237 = vst [vmem:[#allocation10_spill] sm:$0xff] %v2049_v22  ;;  %v2053_v18 = vpop.f32.mrb[26].mxu1  ;;  %v2055_v25 = vpop.f32.mrb[26].mxu0 }
 0x156   : > { %2238 = vst [vmem:[#allocation11_spill] sm:$0xff] %v2053_v18  ;;  %v2057_v26 = vpop.f32.mrb[27].mxu1  ;;  %v2059_v27 = vpop.f32.mrb[27].mxu0 }
 0x157   : > { %2239 = vst [vmem:[#allocation12_spill] sm:$0xff] %v2057_v26 }
 0x15b   : > { %v2061_v28 = vpop.f32.mrb[28].mxu1  ;;  %v2063_v29 = vpop.f32.mrb[28].mxu0 }
 0x15c   : > { %2240 = vst [vmem:[#allocation13_spill] sm:$0xff] %v2061_v28  ;;  %v2065_v24 = vpop.f32.mrb[29].mxu1  ;;  %v2067_v31 = vpop.f32.mrb[29].mxu0 }
 0x15d   : > { %2241 = vst [vmem:[#allocation14_spill] sm:$0xff] %v2065_v24  ;;  %v2069_v32 = vpop.f32.mrb[30].mxu1  ;;  %v2071_v33 = vpop.f32.mrb[30].mxu0 }
 0x15e   : > { %2242 = vst [vmem:[#allocation15_spill] sm:$0xff] %v2069_v32  ;;  %v2073_v34 = vpop.f32.mrb[31].mxu1  ;;  %v2075_v35 = vpop.f32.mrb[31].mxu0 }
 0x15f   : > { %2243 = vst [vmem:[#allocation16_spill] sm:$0xff] %v2073_v34 }
 0x163   : > { %v766_v18 = vpop.f32.mrb[32].mxu1 }
 0x164   : > { %v925_v26 = vmul.f32 %v766_v18, %v1951_v37  ;;  %v768_v22 = vpop.f32.mrb[33].mxu1 }
 0x165   : > { %v926_v28 = vmul.f32 %v768_v22, %v1955_v38  ;;  %v770_v20 = vpop.f32.mrb[34].mxu1 }
 0x166   : > { %v927_v17 = vmul.f32 %v770_v20, %v1959_v40  ;;  %v772_v24 = vpop.f32.mrb[35].mxu1 }
 0x167   : > { %v928_v15 = vmul.f32 %v772_v24, %v1963_v42  ;;  %1085 = vmatprep.mubr.f32.mxu0 %v926_v28 }
 0x168   : > { %1086 = vmatmul.mubr.f32.vlgmr.msra.gmra.mrb[32].mxu0 %v925_v26 }
 0x169   : > { %1090 = vmatprep.mubr.f32.mxu0 %v928_v15 }
 0x16b   : > { %v776_v32 = vpop.f32.mrb[36].mxu1 }
 0x16c   : > { %v929_v34 = vmul.f32 %v776_v32, %v1967_v0  ;;  %v778_v13 = vpop.f32.mrb[37].mxu1  ;;  %1091 = vmatmul.mubr.f32.gmra.mrb[34].mxu0 %v927_v17 }
 0x16d   : > { %v930_v11 = vmul.f32 %v778_v13, %v1971_v45  ;;  %v780_v37 = vpop.f32.mrb[38].mxu1 }
 0x16e   : > { %v931_v18 = vmul.f32 %v780_v37, %v1975_v47  ;;  %v782_v38 = vpop.f32.mrb[39].mxu1 }
 0x16f   : > { %v932_v22 = vmul.f32 %v782_v38, %v1979_v49  ;;  %1095 = vmatprep.mubr.f32.mxu0 %v930_v11 }
 0x170   : > { %1096 = vmatmul.mubr.f32.gmra.mrb[36].mxu0 %v929_v34 }
 0x171   : > { %1100 = vmatprep.mubr.f32.mxu0 %v932_v22 }
 0x173   : > { %v786_v40 = vpop.f32.mrb[40].mxu1 }
 0x174   : > { %v933_v42 = vmul.f32 %v786_v40, %v1983_v51  ;;  %v788_v15 = vpop.f32.mrb[41].mxu1  ;;  %1101 = vmatmul.mubr.f32.gmra.mrb[38].mxu0 %v931_v18 }
 0x175   : > { %v934_v0 = vmul.f32 %v788_v15, %v1987_v53  ;;  %v790_v20 = vpop.f32.mrb[42].mxu1 }
 0x176   : > { %v935_v17 = vmul.f32 %v790_v20, %v1991_v55  ;;  %v792_v45 = vpop.f32.mrb[43].mxu1 }
 0x177   : > { %v936_v13 = vmul.f32 %v792_v45, %v1995_v57  ;;  %1105 = vmatprep.mubr.f32.mxu0 %v934_v0 }
 0x178   : > { %1106 = vmatmul.mubr.f32.gmra.mrb[40].mxu0 %v933_v42 }
 0x179   : > { %1110 = vmatprep.mubr.f32.mxu0 %v936_v13 }
 0x17b   : > { %v796_v47 = vpop.f32.mrb[44].mxu1 }
 0x17c   : > { %v937_v49 = vmul.f32 %v796_v47, %v1999_v59  ;;  %v798_v11 = vpop.f32.mrb[45].mxu1  ;;  %1111 = vmatmul.mubr.f32.gmra.mrb[42].mxu0 %v935_v17 }
 0x17d   : > { %v938_v51 = vmul.f32 %v798_v11, %v2003_v61  ;;  %v800_v26 = vpop.f32.mrb[46].mxu1 }
 0x17e   : > { %v939_v28 = vmul.f32 %v800_v26, %v2007_v63  ;;  %v802_v53 = vpop.f32.mrb[47].mxu1 }
 0x17f   : > { %v940_v24 = vmul.f32 %v802_v53, %v2011_v2  ;;  %1115 = vmatprep.mubr.f32.mxu0 %v938_v51 }
 0x180   : > { %1116 = vmatmul.mubr.f32.gmra.mrb[44].mxu0 %v937_v49 }
 0x181   : > { %1120 = vmatprep.mubr.f32.mxu0 %v940_v24 }
 0x183   : > { %v806_v55 = vpop.f32.mrb[48].mxu1 }
 0x184   : > { %v941_v57 = vmul.f32 %v806_v55, %v2015_v4  ;;  %v808_v32 = vpop.f32.mrb[49].mxu1  ;;  %1121 = vmatmul.mubr.f32.gmra.mrb[46].mxu0 %v939_v28 }
 0x185   : > { %v942_v59 = vmul.f32 %v808_v32, %v2019_v6  ;;  %v810_v34 = vpop.f32.mrb[50].mxu1 }
 0x186   : > { %v943_v37 = vmul.f32 %v810_v34, %v2023_v8  ;;  %v812_v61 = vpop.f32.mrb[51].mxu1 }
 0x187   : > { %v944_v18 = vmul.f32 %v812_v61, %v2027_v10  ;;  %1125 = vmatprep.mubr.f32.mxu0 %v942_v59 }
 0x188   : > { %1126 = vmatmul.mubr.f32.gmra.mrb[48].mxu0 %v941_v57 }
 0x189   : > { %1130 = vmatprep.mubr.f32.mxu0 %v944_v18 }
 0x18b   : > { %v816_v63 = vpop.f32.mrb[52].mxu1 }
 0x18c   : > { %v945_v2 = vmul.f32 %v816_v63, %v2031_v12  ;;  %v818_v38 = vpop.f32.mrb[53].mxu1  ;;  %1131 = vmatmul.mubr.f32.gmra.mrb[50].mxu0 %v943_v37 }
 0x18d   : > { %v946_v4 = vmul.f32 %v818_v38, %v2035_v14  ;;  %v820_v22 = vpop.f32.mrb[54].mxu1 }
 0x18e   : > { %v947_v40 = vmul.f32 %v820_v22, %v2039_v16  ;;  %v822_v6 = vpop.f32.mrb[55].mxu1 }
 0x18f   : > { %v948_v42 = vmul.f32 %v822_v6, %v2043_v19  ;;  %1135 = vmatprep.mubr.f32.mxu0 %v946_v4 }
 0x190   : > { %1136 = vmatmul.mubr.f32.gmra.mrb[52].mxu0 %v945_v2 }
 0x191   : > { %1140 = vmatprep.mubr.f32.mxu0 %v948_v42 }
 0x193   : > { %v826_v8 = vpop.f32.mrb[56].mxu1 }
 0x194   : > { %v949_v10 = vmul.f32 %v826_v8, %v2047_v21  ;;  %v828_v15 = vpop.f32.mrb[57].mxu1  ;;  %1141 = vmatmul.mubr.f32.gmra.mrb[54].mxu0 %v947_v40  ;;  %v2245_v8 = vld [vmem:[#allocation6_spill] sm:$0xff] }
 0x195   : > { %v950_v12 = vmul.f32 %v828_v15, %v2051_v23  ;;  %v830_v0 = vpop.f32.mrb[58].mxu1  ;;  %v2246_v15 = vld [vmem:[#allocation7_spill] sm:$0xff] }
 0x196   : > { %v951_v20 = vmul.f32 %v830_v0, %v2055_v25  ;;  %v832_v14 = vpop.f32.mrb[59].mxu1  ;;  %v2247_v0 = vld [vmem:[#allocation8_spill] sm:$0xff] }
 0x197   : > { %v952_v17 = vmul.f32 %v832_v14, %v2059_v27  ;;  %1145 = vmatprep.mubr.f32.mxu0 %v950_v12 }
 0x198   : > { %1146 = vmatmul.mubr.f32.gmra.mrb[56].mxu0 %v949_v10 }
 0x199   : > { %1150 = vmatprep.mubr.f32.mxu0 %v952_v17 }
 0x19b   : > { %v836_v16 = vpop.f32.mrb[60].mxu1 }
 0x19c   : > { %v953_v19 = vmul.f32 %v836_v16, %v2063_v29  ;;  %v838_v45 = vpop.f32.mrb[61].mxu1  ;;  %1151 = vmatmul.mubr.f32.gmra.mrb[58].mxu0 %v951_v20  ;;  %v2249_v16 = vld [vmem:[#allocation10_spill] sm:$0xff] }
 0x19d   : > { %v954_v21 = vmul.f32 %v838_v45, %v2067_v31  ;;  %v840_v13 = vpop.f32.mrb[62].mxu1 }
 0x19e   : > { %v955_v47 = vmul.f32 %v840_v13, %v2071_v33  ;;  %v842_v23 = vpop.f32.mrb[63].mxu1 }
 0x19f   : > { %v956_v49 = vmul.f32 %v842_v23, %v2075_v35  ;;  %1155 = vmatprep.mubr.f32.mxu0 %v954_v21  ;;  %v2250_v21 = vld [vmem:[#allocation11_spill] sm:$0xff]  ;;  %v2251_v23 = vld [vmem:[#allocation12_spill] sm:$0xff] }
 0x1a0   : > { %1156 = vmatmul.mubr.f32.gmra.mrb[60].mxu0 %v953_v19 }
 0x1a1   : > { %1160 = vmatprep.mubr.f32.mxu0 %v956_v49 }
 0x1a3   : > { %v846_v25 = vpop.f32.mrb[64].mxu1 }
 0x1a4   : > { %v957_v27 = vmul.f32 %v846_v25, %v1949_v30  ;;  %v848_v11 = vpop.f32.mrb[65].mxu1  ;;  %1161 = vmatmul.mubr.f32.gmra.mrb[62].mxu0 %v955_v47 }
 0x1a5   : > { %v958_v29 = vmul.f32 %v848_v11, %v1953_v36  ;;  %v850_v51 = vpop.f32.mrb[66].mxu1 }
 0x1a6   : > { %v959_v26 = vmul.f32 %v850_v51, %v1957_v39  ;;  %v852_v31 = vpop.f32.mrb[67].mxu1  ;;  %v2253_v51 = vld [vmem:[#allocation14_spill] sm:$0xff] }
 0x1a7   : > { %v960_v28 = vmul.f32 %v852_v31, %v1961_v41  ;;  %1165 = vmatprep.mubr.f32.mxu0 %v958_v29 }
 0x1a8   : > { %1166 = vmatmul.mubr.f32.gmra.mrb[64].mxu0 %v957_v27  ;;  %v2252_v27 = vld [vmem:[#allocation13_spill] sm:$0xff] }
 0x1a9   : > { %1170 = vmatprep.mubr.f32.mxu0 %v960_v28  ;;  %v2254_v28 = vld [vmem:[#allocation15_spill] sm:$0xff] }
 0x1ab   : > { %v856_v33 = vpop.f32.mrb[68].mxu1 }
 0x1ac   : > { %v961_v35 = vmul.f32 %v856_v33, %v1965_v43  ;;  %v858_v53 = vpop.f32.mrb[69].mxu1  ;;  %1171 = vmatmul.mubr.f32.gmra.mrb[66].mxu0 %v959_v26 }
 0x1ad   : > { %v962_v30 = vmul.f32 %v858_v53, %v1969_v44  ;;  %v860_v24 = vpop.f32.mrb[70].mxu1  ;;  %v2255_v53 = vld [vmem:[#allocation16_spill] sm:$0xff] }
 0x1ae   : > { %v963_v55 = vmul.f32 %v860_v24, %v1973_v46  ;;  %v862_v36 = vpop.f32.mrb[71].mxu1 }
 0x1af   : > { %v964_v57 = vmul.f32 %v862_v36, %v1977_v48  ;;  %1175 = vmatprep.mubr.f32.mxu0 %v962_v30 }
 0x1b0   : > { %1176 = vmatmul.mubr.f32.gmra.mrb[68].mxu0 %v961_v35 }
 0x1b1   : > { %1180 = vmatprep.mubr.f32.mxu0 %v964_v57 }
 0x1b3   : > { %v866_v39 = vpop.f32.mrb[72].mxu1 }
 0x1b4   : > { %v965_v41 = vmul.f32 %v866_v39, %v1981_v50  ;;  %v868_v32 = vpop.f32.mrb[73].mxu1  ;;  %1181 = vmatmul.mubr.f32.gmra.mrb[70].mxu0 %v963_v55 }
 0x1b5   : > { %v966_v43 = vmul.f32 %v868_v32, %v1985_v52  ;;  %v870_v59 = vpop.f32.mrb[74].mxu1 }
 0x1b6   : > { %v967_v34 = vmul.f32 %v870_v59, %v1989_v54  ;;  %v872_v44 = vpop.f32.mrb[75].mxu1 }
 0x1b7   : > { %v968_v37 = vmul.f32 %v872_v44, %v1993_v56  ;;  %1185 = vmatprep.mubr.f32.mxu0 %v966_v43 }
 0x1b8   : > { %1186 = vmatmul.mubr.f32.gmra.mrb[72].mxu0 %v965_v41 }
 0x1b9   : > { %1190 = vmatprep.mubr.f32.mxu0 %v968_v37 }
 0x1bb   : > { %v876_v46 = vpop.f32.mrb[76].mxu1 }
 0x1bc   : > { %v969_v48 = vmul.f32 %v876_v46, %v1997_v58  ;;  %v878_v61 = vpop.f32.mrb[77].mxu1  ;;  %1191 = vmatmul.mubr.f32.gmra.mrb[74].mxu0 %v967_v34 }
 0x1bd   : > { %v970_v50 = vmul.f32 %v878_v61, %v2001_v60  ;;  %v880_v18 = vpop.f32.mrb[78].mxu1 }
 0x1be   : > { %v971_v63 = vmul.f32 %v880_v18, %v2005_v62  ;;  %v882_v52 = vpop.f32.mrb[79].mxu1 }
 0x1bf   : > { %v972_v2 = vmul.f32 %v882_v52, %v2009_v1  ;;  %1195 = vmatprep.mubr.f32.mxu0 %v970_v50  ;;  %v2244_v1 = vld [vmem:[#allocation5_spill] sm:$0xff] }
 0x1c0   : > { %1196 = vmatmul.mubr.f32.gmra.mrb[76].mxu0 %v969_v48 }
 0x1c1   : > { %1200 = vmatprep.mubr.f32.mxu0 %v972_v2 }
 0x1c3   : > { %v886_v54 = vpop.f32.mrb[80].mxu1 }
 0x1c4   : > { %v973_v56 = vmul.f32 %v886_v54, %v2013_v3  ;;  %v888_v38 = vpop.f32.mrb[81].mxu1  ;;  %1201 = vmatmul.mubr.f32.gmra.mrb[78].mxu0 %v971_v63 }
 0x1c5   : > { %v974_v58 = vmul.f32 %v888_v38, %v2017_v5  ;;  %v890_v4 = vpop.f32.mrb[82].mxu1 }
 0x1c6   : > { %v975_v22 = vmul.f32 %v890_v4, %v2021_v7  ;;  %v892_v60 = vpop.f32.mrb[83].mxu1 }
 0x1c7   : > { %v976_v40 = vmul.f32 %v892_v60, %v2025_v9  ;;  %1205 = vmatprep.mubr.f32.mxu0 %v974_v58  ;;  %v2248_v9 = vld [vmem:[#allocation9_spill] sm:$0xff] }
 0x1c8   : > { %1206 = vmatmul.mubr.f32.gmra.mrb[80].mxu0 %v973_v56 }
 0x1c9   : > { %1210 = vmatprep.mubr.f32.mxu0 %v976_v40 }
 0x1cb   : > { %v896_v62 = vpop.f32.mrb[84].mxu1 }
 0x1cc   : > { %v977_v6 = vmul.f32 %v896_v62, %v2244_v1  ;;  %v898_v42 = vpop.f32.mrb[85].mxu1  ;;  %1211 = vmatmul.mubr.f32.gmra.mrb[82].mxu0 %v975_v22 }
 0x1cd   : > { %v978_v3 = vmul.f32 %v898_v42, %v2245_v8  ;;  %v900_v10 = vpop.f32.mrb[86].mxu1 }
 0x1ce   : > { %v979_v12 = vmul.f32 %v900_v10, %v2246_v15  ;;  %v902_v5 = vpop.f32.mrb[87].mxu1 }
 0x1cf   : > { %v980_v20 = vmul.f32 %v902_v5, %v2247_v0  ;;  %1215 = vmatprep.mubr.f32.mxu0 %v978_v3 }
 0x1d0   : > { %1216 = vmatmul.mubr.f32.gmra.mrb[84].mxu0 %v977_v6 }
 0x1d1   : > { %1220 = vmatprep.mubr.f32.mxu0 %v980_v20 }
 0x1d3   : > { %v906_v7 = vpop.f32.mrb[88].mxu1 }
 0x1d4   : > { %v981_v14 = vmul.f32 %v906_v7, %v2248_v9  ;;  %v908_v17 = vpop.f32.mrb[89].mxu1  ;;  %1221 = vmatmul.mubr.f32.gmra.mrb[86].mxu0 %v979_v12 }
 0x1d5   : > { %v982_v19 = vmul.f32 %v908_v17, %v2249_v16  ;;  %v910_v45 = vpop.f32.mrb[90].mxu1 }
 0x1d6   : > { %v983_v13 = vmul.f32 %v910_v45, %v2250_v21  ;;  %v912_v47 = vpop.f32.mrb[91].mxu1 }
 0x1d7   : > { %v984_v49 = vmul.f32 %v912_v47, %v2251_v23  ;;  %1225 = vmatprep.mubr.f32.mxu0 %v982_v19 }
 0x1d8   : > { %1226 = vmatmul.mubr.f32.gmra.mrb[88].mxu0 %v981_v14 }
 0x1d9   : > { %1230 = vmatprep.mubr.f32.mxu0 %v984_v49 }
 0x1db   : > { %v916_v25 = vpop.f32.mrb[92].mxu1 }
 0x1dc   : > { %v985_v11 = vmul.f32 %v916_v25, %v2252_v27  ;;  %v918_v29 = vpop.f32.mrb[93].mxu1  ;;  %1231 = vmatmul.mubr.f32.gmra.mrb[90].mxu0 %v983_v13 }
 0x1dd   : > { %v986_v26 = vmul.f32 %v918_v29, %v2253_v51  ;;  %v920_v31 = vpop.f32.mrb[94].mxu1 }
 0x1de   : > { %v987_v33 = vmul.f32 %v920_v31, %v2254_v28  ;;  %v922_v35 = vpop.f32.mrb[95].mxu1 }
 0x1df   : > { %v988_v30 = vmul.f32 %v922_v35, %v2255_v53  ;;  %1235 = vmatprep.mubr.f32.mxu0 %v986_v26 }
 0x1e0   : > { %1236 = vmatmul.mubr.f32.gmra.mrb[92].mxu0 %v985_v11 }
 0x1e1   : > { %1240 = vmatprep.mubr.f32.mxu0 %v988_v30 }
 0x1e4   : > { %1241 = vmatmul.mubr.f32.gmra.mrb[94].mxu0 %v987_v33 }
 0x23b   : > { %v1087_v24 = vpop.f32.mrb[32].mxu0 }
 0x23c   : > { %1247 = vst.msk [vmem:[%s2145_s10] sm:$0xff] %vm1246_vm0, %v1087_v24  ;;  %v1089_v55 = vpop.f32.mrb[33].mxu0 }
 0x23f   : > { %v1092_v36 = vpop.f32.mrb[34].mxu0 }
 0x240   : > { %1248 = vst.msk [vmem:[%s2145_s10 + $0x8] sm:$0xff] %vm1246_vm0, %v1092_v36  ;;  %v1094_v57 = vpop.f32.mrb[35].mxu0 }
 0x243   : > { %v1097_v39 = vpop.f32.mrb[36].mxu0 }
 0x244   : > { %1249 = vst.msk [vmem:[%s2145_s10 + $0x10] sm:$0xff] %vm1246_vm0, %v1097_v39  ;;  %v1099_v41 = vpop.f32.mrb[37].mxu0 }
 0x247   : > { %v1102_v32 = vpop.f32.mrb[38].mxu0 }
 0x248   : > { %1250 = vst.msk [vmem:[%s2145_s10 + $0x18] sm:$0xff] %vm1246_vm0, %v1102_v32  ;;  %v1104_v43 = vpop.f32.mrb[39].mxu0 }
 0x24b   : > { %v1107_v59 = vpop.f32.mrb[40].mxu0 }
 0x24c   : > { %1251 = vst.msk [vmem:[%s2145_s10 + $0x20] sm:$0xff] %vm1246_vm0, %v1107_v59  ;;  %v1109_v34 = vpop.f32.mrb[41].mxu0 }
 0x24f   : > { %v1112_v44 = vpop.f32.mrb[42].mxu0 }
 0x250   : > { %1252 = vst.msk [vmem:[%s2145_s10 + $0x28] sm:$0xff] %vm1246_vm0, %v1112_v44  ;;  %v1114_v37 = vpop.f32.mrb[43].mxu0 }
 0x253   : > { %v1117_v46 = vpop.f32.mrb[44].mxu0 }
 0x254   : > { %1253 = vst.msk [vmem:[%s2145_s10 + $0x30] sm:$0xff] %vm1246_vm0, %v1117_v46  ;;  %v1119_v48 = vpop.f32.mrb[45].mxu0 }
 0x257   : > { %v1122_v61 = vpop.f32.mrb[46].mxu0 }
 0x258   : > { %1254 = vst.msk [vmem:[%s2145_s10 + $0x38] sm:$0xff] %vm1246_vm0, %v1122_v61  ;;  %v1124_v50 = vpop.f32.mrb[47].mxu0 }
 0x25b   : > { %v1127_v18 = vpop.f32.mrb[48].mxu0 }
 0x25c   : > { %1255 = vst.msk [vmem:[%s2145_s10 + $0x40] sm:$0xff] %vm1246_vm0, %v1127_v18  ;;  %v1129_v63 = vpop.f32.mrb[49].mxu0 }
 0x25f   : > { %v1132_v52 = vpop.f32.mrb[50].mxu0 }
 0x260   : > { %1256 = vst.msk [vmem:[%s2145_s10 + $0x48] sm:$0xff] %vm1246_vm0, %v1132_v52  ;;  %v1134_v2 = vpop.f32.mrb[51].mxu0 }
 0x263   : > { %v1137_v54 = vpop.f32.mrb[52].mxu0 }
 0x264   : > { %1257 = vst.msk [vmem:[%s2145_s10 + $0x50] sm:$0xff] %vm1246_vm0, %v1137_v54  ;;  %v1139_v56 = vpop.f32.mrb[53].mxu0 }
 0x267   : > { %v1142_v38 = vpop.f32.mrb[54].mxu0 }
 0x268   : > { %1258 = vst.msk [vmem:[%s2145_s10 + $0x58] sm:$0xff] %vm1246_vm0, %v1142_v38  ;;  %v1144_v58 = vpop.f32.mrb[55].mxu0 }
 0x26b   : > { %v1147_v4 = vpop.f32.mrb[56].mxu0 }
 0x26c   : > { %1259 = vst.msk [vmem:[%s2145_s10 + $0x60] sm:$0xff] %vm1246_vm0, %v1147_v4  ;;  %v1149_v22 = vpop.f32.mrb[57].mxu0 }
 0x26f   : > { %v1152_v60 = vpop.f32.mrb[58].mxu0 }
 0x270   : > { %1260 = vst.msk [vmem:[%s2145_s10 + $0x68] sm:$0xff] %vm1246_vm0, %v1152_v60  ;;  %v1154_v40 = vpop.f32.mrb[59].mxu0 }
 0x273   : > { %v1157_v62 = vpop.f32.mrb[60].mxu0 }
 0x274   : > { %1261 = vst.msk [vmem:[%s2145_s10 + $0x70] sm:$0xff] %vm1246_vm0, %v1157_v62  ;;  %v1159_v1 = vpop.f32.mrb[61].mxu0 }
 0x277   : > { %v1162_v6 = vpop.f32.mrb[62].mxu0 }
 0x278   : > { %1262 = vst.msk [vmem:[%s2145_s10 + $0x78] sm:$0xff] %vm1246_vm0, %v1162_v6  ;;  %v1164_v42 = vpop.f32.mrb[63].mxu0 }
 0x27b   : > { %v1167_v8 = vpop.f32.mrb[64].mxu0 }
 0x27c   : > { %1263 = vst.msk [vmem:[%s2145_s10 + $0x80] sm:$0xff] %vm1246_vm0, %v1167_v8  ;;  %v1169_v3 = vpop.f32.mrb[65].mxu0 }
 0x27f   : > { %v1172_v10 = vpop.f32.mrb[66].mxu0 }
 0x280   : > { %1264 = vst.msk [vmem:[%s2145_s10 + $0x88] sm:$0xff] %vm1246_vm0, %v1172_v10  ;;  %v1174_v15 = vpop.f32.mrb[67].mxu0 }
 0x283   : > { %v1177_v12 = vpop.f32.mrb[68].mxu0 }
 0x284   : > { %1265 = vst.msk [vmem:[%s2145_s10 + $0x90] sm:$0xff] %vm1246_vm0, %v1177_v12  ;;  %v1179_v5 = vpop.f32.mrb[69].mxu0 }
 0x287   : > { %v1182_v0 = vpop.f32.mrb[70].mxu0 }
 0x288   : > { %1266 = vst.msk [vmem:[%s2145_s10 + $0x98] sm:$0xff] %vm1246_vm0, %v1182_v0  ;;  %v1184_v20 = vpop.f32.mrb[71].mxu0 }
 0x28b   : > { %v1187_v7 = vpop.f32.mrb[72].mxu0 }
 0x28c   : > { %1267 = vst.msk [vmem:[%s2145_s10 + $0xa0] sm:$0xff] %vm1246_vm0, %v1187_v7  ;;  %v1189_v9 = vpop.f32.mrb[73].mxu0 }
 0x28f   : > { %v1192_v14 = vpop.f32.mrb[74].mxu0 }
 0x290   : > { %1268 = vst.msk [vmem:[%s2145_s10 + $0xa8] sm:$0xff] %vm1246_vm0, %v1192_v14  ;;  %v1194_v17 = vpop.f32.mrb[75].mxu0 }
 0x293   : > { %v1197_v16 = vpop.f32.mrb[76].mxu0 }
 0x294   : > { %1269 = vst.msk [vmem:[%s2145_s10 + $0xb0] sm:$0xff] %vm1246_vm0, %v1197_v16  ;;  %v1199_v19 = vpop.f32.mrb[77].mxu0 }
 0x297   : > { %v1202_v45 = vpop.f32.mrb[78].mxu0 }
 0x298   : > { %1270 = vst.msk [vmem:[%s2145_s10 + $0xb8] sm:$0xff] %vm1246_vm0, %v1202_v45  ;;  %v1204_v21 = vpop.f32.mrb[79].mxu0 }
 0x29b   : > { %v1207_v13 = vpop.f32.mrb[80].mxu0 }
 0x29c   : > { %1271 = vst.msk [vmem:[%s2145_s10 + $0xc0] sm:$0xff] %vm1246_vm0, %v1207_v13  ;;  %v1209_v47 = vpop.f32.mrb[81].mxu0 }
 0x29f   : > { %v1212_v23 = vpop.f32.mrb[82].mxu0 }
 0x2a0   : > { %1272 = vst.msk [vmem:[%s2145_s10 + $0xc8] sm:$0xff] %vm1246_vm0, %v1212_v23  ;;  %v1214_v49 = vpop.f32.mrb[83].mxu0 }
 0x2a3   : > { %v1217_v25 = vpop.f32.mrb[84].mxu0 }
 0x2a4   : > { %1273 = vst.msk [vmem:[%s2145_s10 + $0xd0] sm:$0xff] %vm1246_vm0, %v1217_v25  ;;  %v1219_v27 = vpop.f32.mrb[85].mxu0 }
 0x2a7   : > { %v1222_v11 = vpop.f32.mrb[86].mxu0 }
 0x2a8   : > { %1274 = vst.msk [vmem:[%s2145_s10 + $0xd8] sm:$0xff] %vm1246_vm0, %v1222_v11  ;;  %v1224_v29 = vpop.f32.mrb[87].mxu0 }
 0x2ab   : > { %v1227_v51 = vpop.f32.mrb[88].mxu0 }
 0x2ac   : > { %1275 = vst.msk [vmem:[%s2145_s10 + $0xe0] sm:$0xff] %vm1246_vm0, %v1227_v51  ;;  %v1229_v26 = vpop.f32.mrb[89].mxu0 }
 0x2af   : > { %v1232_v31 = vpop.f32.mrb[90].mxu0 }
 0x2b0   : > { %1276 = vst.msk [vmem:[%s2145_s10 + $0xe8] sm:$0xff] %vm1246_vm0, %v1232_v31  ;;  %v1234_v28 = vpop.f32.mrb[91].mxu0 }
 0x2b3   : > { %v1237_v33 = vpop.f32.mrb[92].mxu0 }
 0x2b4   : > { %1277 = vst.msk [vmem:[%s2145_s10 + $0xf0] sm:$0xff] %vm1246_vm0, %v1237_v33  ;;  %v1239_v35 = vpop.f32.mrb[93].mxu0 }
 0x2b7   : > { %v1242_v53 = vpop.f32.mrb[94].mxu0 }
 0x2b8   : > { %1278 = vst.msk [vmem:[%s2145_s10 + $0xf8] sm:$0xff] %vm1246_vm0, %v1242_v53  ;;  %v1244_v30 = vpop.f32.mrb[95].mxu0 }
 0x2b9 PF: > { %s14_s14 = sadd.s32 1, %s1650_s14   ;;  %s2256_s12 = smov %s1646_s13 }
 0x2ba   : > { %p11_p4 = scmp.ge.s32.totalorder %s14_s14, 4   ;;  %s2257_s13 = smov %s2259_s16 }
 0x2bc   :  { %13 = sbr.rel (!%p11_p4) target bundleno = 2 (0x2), region = 68 }
 0x2c3   :  { %1307 = vsyncpa [#allocation3], 1 }
 0x2c4   :  { %1309 = vsyncpa [#allocation3 + $0x1], 1 }

</bundles_post_ra>
